<compile_context>
chip_gen: v7x
topology: tpu7x:2x2x1
jax: 0.10.0
libtpu: 0.0.40
codegen_flags: <defaults>
</compile_context>

<pallas_src>
import math
from functools import partial

import numpy as np
import jax
import jax.numpy as jnp
from jax.experimental import pallas as pl
from jax.experimental.pallas import tpu as pltpu


# -----------------------------------------------------------------------------
# torchvision.transforms.functional._get_inverse_affine_matrix (pure python glue)
# -----------------------------------------------------------------------------
def _get_inverse_affine_matrix(center, angle, translate, scale, shear):
    rot = math.radians(angle)
    sx = math.radians(shear[0])
    sy = math.radians(shear[1])
    cx, cy = center
    tx, ty = translate

    a = math.cos(rot - sy) / math.cos(sy)
    b = -math.cos(rot - sy) * math.tan(sx) / math.cos(sy) - math.sin(rot)
    c = math.sin(rot - sy) / math.cos(sy)
    d = -math.sin(rot - sy) * math.tan(sx) / math.cos(sy) + math.cos(rot)

    matrix = [d, -b, 0.0, -c, a, 0.0]
    matrix = [x / scale for x in matrix]
    matrix[2] += matrix[0] * (-cx - tx) + matrix[1] * (-cy - ty)
    matrix[5] += matrix[3] * (-cx - tx) + matrix[4] * (-cy - ty)
    matrix[2] += cx
    matrix[5] += cy
    return matrix  # [m00, m01, m02, m10, m11, m12]


# -----------------------------------------------------------------------------
# Host-side index precompute (affine matrix is Python floats -> do it once, reuse for RGB+TIR).
# Replicates torchvision F.affine tensor path: affine_grid + grid_sample(nearest, zeros,
# align_corners=False) collapses to this pixel-space form; np.rint == round-half-to-even
# matches std::nearbyint used by grid_sample's nearest mode.
# -----------------------------------------------------------------------------
def _compute_src_indices(matrix6, H, W):
    m00, m01, m02, m10, m11, m12 = (np.float32(m) for m in matrix6)
    o = np.arange(H * W, dtype=np.int32)
    row = (o // W).astype(np.float32)
    col = (o % W).astype(np.float32)
    cx = np.float32((W - 1) * 0.5)
    cy = np.float32((H - 1) * 0.5)
    ix = m00 * (col - cx) + m01 * (row - cy) + m02 + cx
    iy = m10 * (col - cx) + m11 * (row - cy) + m12 + cy
    jx = np.rint(ix).astype(np.int64)
    jy = np.rint(iy).astype(np.int64)
    valid = (jx >= 0) & (jx < W) & (jy >= 0) & (jy < H)
    src = np.where(valid, jy * W + jx, -1).astype(np.int32)   # -1 => zero fill
    return src.reshape(1, H * W)


def _pick_tile(HW, sel_budget_bytes=8 << 20):
    # largest lane-dense tile that (a) divides HW, (b) leaves a grid >= 2 so the pipeline runs,
    # (c) keeps the per-tile one-hot slab (HW x TILE x 4B) within the VMEM budget.
    for t in (2048, 1024, 512, 256, 128):
        if HW % t == 0 and HW // t >= 2 and HW * t * 4 <= sel_budget_bytes:
            return t
    return HW  # single block fallback (small / oddly-sized images)


# -----------------------------------------------------------------------------
# Kernel 1: fused RGB+TIR nearest-neighbor affine warp, tiled over output columns.
#   out(2C, TILE) = img(2C, HW) @ onehot(HW, TILE)     (zero column for OOB -> fill=0)
# -----------------------------------------------------------------------------
def _affine_warp_kernel(src_ref, img_ref, out_ref, *, HW):
    src = src_ref[...]                                            # (1, TILE) int32, -1 == OOB
    tile = src.shape[-1]
    s_iota = jax.lax.broadcasted_iota(jnp.int32, (HW, tile), 0)
    sel = (s_iota == src).astype(jnp.float32)                     # (HW, TILE) one-hot slab
    out_ref[...] = jnp.dot(img_ref[...], sel, preferred_element_type=jnp.float32)


def affine_warp_pair(rgb_chw, tir_chw, matrix6):
    c_rgb, H, W = rgb_chw.shape
    c_tir = tir_chw.shape[0]
    HW = H * W
    two_c = c_rgb + c_tir

    src = jnp.asarray(_compute_src_indices(matrix6, H, W))        # (1, HW) int32
    stacked = jnp.concatenate(
        [rgb_chw.reshape(c_rgb, HW), tir_chw.reshape(c_tir, HW)], axis=0
    ).astype(jnp.float32)                                          # (2C, HW)

    TILE = _pick_tile(HW)
    grid = (HW // TILE,)

    # explicit VMEM budget: resident image (x2 buffers), per-tile sel slab, src/out double buffers
    vmem_need = 4 * (2 * two_c * HW + HW * TILE + 2 * TILE + 2 * two_c * TILE) + (2 << 20)
    vmem_limit = int(min(vmem_need, 56 << 20))                    # headroom under v7x's 64 MiB

    out = pl.pallas_call(
        partial(_affine_warp_kernel, HW=HW),
        out_shape=jax.ShapeDtypeStruct((two_c, HW), jnp.float32),
        grid=grid,
        in_specs=[
            pl.BlockSpec((1, TILE), lambda j: (0, j)),            # per-tile source indices
            pl.BlockSpec((two_c, HW), lambda j: (0, 0)),          # full image, resident
        ],
        out_specs=pl.BlockSpec((two_c, TILE), lambda j: (0, j)),  # lane-dense output tile
        compiler_params=pltpu.CompilerParams(
            dimension_semantics=("parallel",),                    # megacore-shard on v7x
            vmem_limit_bytes=vmem_limit,
        ),
    )(src, stacked)

    out = out.reshape(two_c, H, W)
    return out[:c_rgb], out[c_rgb:]


# -----------------------------------------------------------------------------
# Kernel 2: affine transform of boxes, lane-major layout (N along lanes).
# -----------------------------------------------------------------------------
def _box_affine_kernel(m_ref, xs_ref, ys_ref, box_ref, valid_ref, *, img_w, img_h):
    m00 = m_ref[0]; m01 = m_ref[1]; m02 = m_ref[2]
    m10 = m_ref[3]; m11 = m_ref[4]; m12 = m_ref[5]

    xs = xs_ref[...]                                  # (4, N) absolute corner xs
    ys = ys_ref[...]                                  # (4, N) absolute corner ys

    # transformed_points = points_homogeneous @ matrix.T
    nx = m00 * xs + m01 * ys + m02
    ny = m10 * xs + m11 * ys + m12

    x_min = jnp.min(nx, axis=0, keepdims=True)        # (1, N)
    x_max = jnp.max(nx, axis=0, keepdims=True)
    y_min = jnp.min(ny, axis=0, keepdims=True)
    y_max = jnp.max(ny, axis=0, keepdims=True)

    valid = (x_max > x_min) & (y_max > y_min)
    valid_ref[...] = valid.astype(jnp.float32)

    # clamp(min=0), clamp(max=img_dim), normalize, clamp(0,1)
    x_min_n = jnp.clip(x_min, 0.0, float(img_w)) / float(img_w)
    x_max_n = jnp.clip(x_max, 0.0, float(img_w)) / float(img_w)
    y_min_n = jnp.clip(y_min, 0.0, float(img_h)) / float(img_h)
    y_max_n = jnp.clip(y_max, 0.0, float(img_h)) / float(img_h)

    rowid = jax.lax.broadcasted_iota(jnp.int32, box_ref.shape, 0)   # (4, N)
    out = jnp.where(rowid == 0, x_min_n,
          jnp.where(rowid == 1, y_min_n,
          jnp.where(rowid == 2, x_max_n, y_max_n)))
    box_ref[...] = jnp.clip(out, 0.0, 1.0)


def apply_affine_to_boxes(boxes, matrix6, img_w, img_h):
    if boxes.shape[0] == 0:
        return boxes
    N = boxes.shape[0]
    scale_vec = jnp.asarray([img_w, img_h, img_w, img_h], jnp.float32)
    b = boxes.astype(jnp.float32) * scale_vec
    x0, y0, x1, y1 = b[:, 0], b[:, 1], b[:, 2], b[:, 3]
    # corner order matches the reference: (x0,y0), (x1,y0), (x1,y1), (x0,y1); lane-major (4, N)
    xs = jnp.stack([x0, x1, x1, x0], axis=0)
    ys = jnp.stack([y0, y0, y1, y1], axis=0)
    m = jnp.asarray(matrix6, jnp.float32)

    boxes_t, valid = pl.pallas_call(
        partial(_box_affine_kernel, img_w=img_w, img_h=img_h),
        out_shape=(jax.ShapeDtypeStruct((4, N), jnp.float32),
                   jax.ShapeDtypeStruct((1, N), jnp.float32)),
        in_specs=[
            pl.BlockSpec(memory_space=pltpu.MemorySpace.SMEM),    # 6 matrix scalars
            pl.BlockSpec(memory_space=pltpu.MemorySpace.VMEM),
            pl.BlockSpec(memory_space=pltpu.MemorySpace.VMEM),
        ],
        out_specs=(pl.BlockSpec(memory_space=pltpu.MemorySpace.VMEM),
                   pl.BlockSpec(memory_space=pltpu.MemorySpace.VMEM)),
    )(m, xs, ys)

    # TODO(synk): the reference filters degenerate boxes to a dynamic-length tensor; that
    # data-dependent shape forces one host sync here (single fused device_get).
    boxes_np, valid_np = jax.device_get((boxes_t, valid))
    mask = valid_np[0] > 0.5
    return jnp.asarray(boxes_np.T[mask], dtype=jnp.float32)


# -----------------------------------------------------------------------------
# AffineTransform "module"
# -----------------------------------------------------------------------------
class AffineTransform:
    def __init__(self, degrees=10.0, translate=(0.1, 0.1), scale=(0.9, 1.1),
                 shear=5.0, prob=0.5, seed=0):
        self.degrees = degrees
        self.translate = translate
        self.scale = scale
        self.shear = shear
        self.prob = prob
        self.seed = seed

    def __call__(self, rgb, tir, target):
        key = jax.random.PRNGKey(self.seed)
        ks = jax.random.split(key, 6)
        u = float(jax.random.uniform(ks[0]))
        if u < self.prob:
            _, h, w = rgb.shape
            angle = float(jax.random.uniform(ks[1], minval=-self.degrees, maxval=self.degrees))
            tx = float(jax.random.uniform(ks[2], minval=-self.translate[0], maxval=self.translate[0]))
            ty = float(jax.random.uniform(ks[3], minval=-self.translate[1], maxval=self.translate[1]))
            scale = float(jax.random.uniform(ks[4], minval=self.scale[0], maxval=self.scale[1]))
            shear = float(jax.random.uniform(ks[5], minval=-self.shear, maxval=self.shear))

            # matrix used for the boxes (center = image center, translate in pixels) -- as in ref
            box_matrix = _get_inverse_affine_matrix((w / 2.0, h / 2.0), angle,
                                                    (tx * w, ty * h), scale, (shear, 0.0))
            # matrix used for the image warp: torchvision F.affine tensor path uses center (0,0)
            # and the translate values passed through unscaled (the reference passes fractions).
            img_matrix = _get_inverse_affine_matrix((0.0, 0.0), angle, (tx, ty), scale, (shear, 0.0))

            rgb, tir = affine_warp_pair(rgb, tir, img_matrix)     # fused single kernel call
            if 'boxes' in target and target['boxes'].shape[0] > 0:
                target['boxes'] = apply_affine_to_boxes(target['boxes'], box_matrix, w, h)
        return rgb, tir, target


# -----------------------------------------------------------------------------
if __name__ == "__main__":
    key = jax.random.PRNGKey(0)
    k_rgb, k_tir, k_xy, k_wh = jax.random.split(key, 4)

    C, H, W = 3, 16, 16
    rgb = jax.random.uniform(k_rgb, (C, H, W), jnp.float32)
    tir = jax.random.uniform(k_tir, (C, H, W), jnp.float32)

    N = 8
    xy = jax.random.uniform(k_xy, (N, 2), jnp.float32, minval=0.05, maxval=0.5)
    wh = jax.random.uniform(k_wh, (N, 2), jnp.float32, minval=0.1, maxval=0.4)
    boxes = jnp.concatenate([xy, jnp.clip(xy + wh, 0.0, 1.0)], axis=1)  # (N,4) normalized
    target = {"boxes": boxes, "labels": jnp.arange(N, dtype=jnp.int32)}

    # prob=1.0 so the (deterministic) transform branch always runs and exercises the kernels.
    transform = AffineTransform(prob=1.0, seed=0)
    rgb_out, tir_out, target_out = transform(rgb, tir, target)

    jax.block_until_ready(rgb_out)
    jax.block_until_ready(tir_out)
    jax.block_until_ready(target_out["boxes"])
    print("KERNEL_OK")
</pallas_src>

<mosaic_0001>
module attributes {stable_mosaic.version = 11 : i64} {
  func.func @_affine_warp_kernel(%arg0: i32, %arg1: memref<1x128xi32, #tpu.memory_space<vmem>>, %arg2: memref<6x256xf32, #tpu.memory_space<vmem>>, %arg3: memref<6x128xf32, #tpu.memory_space<vmem>>) attributes {dimension_semantics = [#tpu.dimension_semantics<parallel>], iteration_bounds = array<i64: 2>, scalar_prefetch = 0 : i64, scratch_operands = 0 : i64, tpu.core_type = #tpu.core_type<tc>, window_params = [{transform_indices = @transform_0, window_bounds = array<i64: 1, 128>}, {pipeline_mode = #tpu.pipeline_mode<synchronous>, transform_indices = @transform_1, window_bounds = array<i64: 6, 256>}, {transform_indices = @transform_2, window_bounds = array<i64: 6, 128>}]} {
    %c0 = arith.constant 0 : index
    %c0_0 = arith.constant 0 : index
    %0 = vector.load %arg1[%c0, %c0_0] : memref<1x128xi32, #tpu.memory_space<vmem>>, vector<1x128xi32>
    %1 = tpu.iota {dimensions = array<i32: 0>} : vector<256x128xi32>
    %2 = vector.broadcast %0 : vector<1x128xi32> to vector<256x128xi32>
    %3 = arith.cmpi eq, %1, %2 : vector<256x128xi32>
    %4 = arith.extui %3 : vector<256x128xi1> to vector<256x128xi32>
    %5 = arith.sitofp %4 : vector<256x128xi32> to vector<256x128xf32>
    %c0_1 = arith.constant 0 : index
    %c0_2 = arith.constant 0 : index
    %6 = vector.load %arg2[%c0_1, %c0_2] : memref<6x256xf32, #tpu.memory_space<vmem>>, vector<6x256xf32>
    %cst = arith.constant dense<0.000000e+00> : vector<6x128xf32>
    %7 = tpu.matmul %6, %5, %cst {dimension_numbers = #tpu.dot_dimension_numbers<[1], [0], [0], [1], [0, 0, 1, 1], [], []>} : vector<6x256xf32>, vector<256x128xf32>, vector<6x128xf32> -> vector<6x128xf32>
    %c0_3 = arith.constant 0 : index
    %c0_4 = arith.constant 0 : index
    %8 = vector.load %arg3[%c0_3, %c0_4] : memref<6x128xf32, #tpu.memory_space<vmem>>, vector<6x128xf32>
    tpu.vector_store %arg3[%c0_3, %c0_4], %7 {strides = array<i32>} : memref<6x128xf32, #tpu.memory_space<vmem>>, vector<6x128xf32>,
    return
  }
  func.func @transform_0(%arg0: i32) -> (i32, i32) {
    %c0_i32 = arith.constant 0 : i32
    %c0_i32_0 = arith.constant 0 : i32
    return %c0_i32, %arg0 : i32, i32
  }
  func.func @transform_1(%arg0: i32) -> (i32, i32) {
    %c0_i32 = arith.constant 0 : i32
    %c0_i32_0 = arith.constant 0 : i32
    %c0_i32_1 = arith.constant 0 : i32
    return %c0_i32, %c0_i32_0 : i32, i32
  }
  func.func @transform_2(%arg0: i32) -> (i32, i32) {
    %c0_i32 = arith.constant 0 : i32
    %c0_i32_0 = arith.constant 0 : i32
    return %c0_i32, %arg0 : i32, i32
  }
}

</mosaic_0001>

<bundles_post_ra>
// kernel: tpu_custom_call.1
= control target key start
LH: loop header
LB: loop body
LE: loop exit
PB: predicated region body
PF: predicated region fallthrough
CT: control target
= control target key end

     0   :  { %7 = vsyncpa [#allocation3], 0  ;;  %s1104_s0 = inlined_call_operand.hbm [shape: s32[1,256], index: 0, kind: input, shape index: {}]   ;;  %s1105_s1 = inlined_call_operand.hbm [shape: f32[6,256], index: 1, kind: input, shape index: {}]   ;;  %s1106_s2 = inlined_call_operand.hbm [shape: f32[6,256], index: 2, kind: output, shape index: {}]  }
   0x1   :  { %9 = vsyncpa [#allocation3 + $0x1], 0 }
   0x2   :  { %10 = vsyncpa [#allocation6], 0 }
   0x3   :  { %11 = vsyncpa [#allocation4], 0 }
   0x4   :  { %13 = vsyncpa [#allocation4 + $0x1], 0  ;;  %s818_s9 = smov 0   ;;  %s820_s10 = smov 0  }
   0x5   :  { %s822_s11 = smov 0   ;;  %s824_s12 = smov 0  }
   0x6 LB: > { %s839_s13 = sadd.s32 4294967295, %s797_s12   ;;  %s467_s14 = sadd.s32 4294967294, %s797_s12   ;;  %s797_s12 = sphi %s824_s12, %s1130_s12   ;;  %s793_s11 = sphi %s822_s11, %s1129_s11   ;;  %s789_s10 = sphi %s820_s10, %s1128_s10   ;;  %s785_s9 = sphi %s818_s9, %s1127_s9  }
   0x7   : > { %p39_p0 = scmp.ne.s32.totalorder %s789_s10, %s785_s9  ;;  %p1107_p1 = scmp.eq.s32.totalorder %s839_s13, 0 }
   0x8   : > { %p90_p3 = scmp.eq.s32.totalorder %s467_s14, 1  ;;  %p468_p5 = scmp.ge.s32.totalorder %s797_s12, 1 }
   0x9   : > { %p848_p4 = por %p1107_p1, %p39_p0  ;;  %p97_p7 = scmp.lt.s32.totalorder %s797_s12, 3 }
   0xa   : > { %p853_p6 = por %p90_p3, %p39_p0  ;;  %s799_s18 = smov [#allocation5]  }
   0xb   : > { %s1110_s15 = scalar_select %p848_p4, 1, 0 }
   0xc   : > { %s1111_s16 = scalar_select %p853_p6, 1, 0 }
   0xd   : > { %p858_p8 = pnand %p468_p5, %p97_p7  ;;  %s110_s19 = sshll.u32 %s799_s18, 4  ;;  %s111_s19 = int_to_ptr.vmem [resolvable:$true] %s110_s19 }
   0xe   : > { %s866_s20 = sadd.s32 1, %s797_s12   ;;  %s26_s24 = sadd.s32 1, %s793_s11 }
   0xf   : > { %s1112_s17 = scalar_select %p858_p8, 1, 0 }
  0x10   : > { %p619_p10 = pneg %p858_p8  ;;  %s23_s22 = ssub.s32 %s797_s12, %s866_s20 }
  0x11   : > { %p876_p12 = scmp.eq.s32.totalorder %s23_s22, 0  ;;  %s669_s27 = scalar_lea.hbm %s1105_s1, 256 }
  0x12   : > { %p870_p11 = pnand %p619_p10, %p1107_p1  ;;  %p670_p0 = scmp.ne.s32.totalorder %s1105_s1, %s669_s27 }
  0x13   : > { %s1114_s23 = scalar_select %p876_p12, 1, 0 }
  0x14   : > { %p671_p3 = pneg %p870_p11  ;;  %p676_p10 = scmp.lt.u32.totalorder %s669_s27, %s1105_s1 }
  0x16   : > { %p672_p5 = pnand %p671_p3, %p670_p0 }
  0x18   : > { %p673_p7 = pneg %p672_p5 }
  0x1a   : > { %p678_p9 = pnand %p676_p10, %p673_p7 }
  0x1c   : > { %681 = shalt.err (!%p678_p9)
}
  0x1d   : > { %s682_s4 = scalar_lea.vmem %s111_s19, 256  ;;  %p690_p6 = scmp.lt.s32.totalorder %s111_s19, %s111_s19 }
  0x1e   : > { %p683_p1 = scmp.ne.s32.totalorder %s111_s19, %s682_s4  ;;  %p691_p4 = scmp.lt.s32.totalorder %s682_s4, %s682_s4 }
  0x20   : > { %p685_p2 = pnand %p683_p1, %p671_p3  ;;  %p692_p8 = por %p691_p4, %p690_p6 }
  0x22   : > { %p686_p13 = pneg %p685_p2 }
  0x24   : > { %p693_p12 = pnand %p692_p8, %p686_p13 }
  0x26   : > { %696 = shalt.err (!%p693_p12)
}
  0x27   : > { %622 = dma.hbm_to_vmem [thread:$0]  (!%p870_p11), %s1105_s1, 256, %s111_s19, [#allocation6]  }
  0x28   : > { %p1115_p1 = scmp.ne.s32.totalorder %s1114_s23, 0  ;;  %p34_p2 = scmp.eq.s32.totalorder %s797_s12, 0 }
  0x29   : > { %p1116_p4 = scmp.ne.s32.totalorder %s793_s11, %s789_s10  ;;  %p1117_p6 = scmp.eq.s32.totalorder %s839_s13, 1 }
  0x2a   : > { %s902_s7 = scalar_select %p1115_p1, %s793_s11, %s26_s24  }
  0x2b   : > { %p910_p8 = por %p1117_p6, %p1116_p4  ;;  %p632_p9 = scmp.lt.s32.totalorder %s797_s12, 2 }
  0x2c   : > { %s121_s14 = sand.u32 1, %s793_s11   ;;  %p1119_p12 = pmov %p1116_p4 }
  0x2d   : > { %s471_s18 = sshll.u32 %s797_s12, 4  ;;  %s124_s19 = scalar_lea.vmem [#allocation2], %s121_s14 }
  0x2e   : > { %p35_p13 = por %p34_p2, %p1119_p12  ;;  %s923_s25 = scalar_lea.hbm %s1104_s0, %s471_s18 }
  0x2f   : > { %s131_s23 = sshll.u32 %s124_s19, 4  ;;  %s122_s26 = scalar_lea.sflag [#allocation3], %s121_s14  ;;  %s925_s23 = int_to_ptr.vmem [resolvable:$true] %s131_s23 }
  0x30   : > { %p927_p11 = pnand %p632_p9, %p35_p13  ;;  %s697_s27 = scalar_lea.hbm %s923_s25, 16 }
  0x31   : > { %p698_p0 = scmp.ne.s32.totalorder %s923_s25, %s697_s27  ;;  %s702_s30 = scalar_lea.hbm %s1104_s0, 32 }
  0x32   : > { %p699_p3 = pneg %p927_p11  ;;  %p703_p10 = scmp.lt.u32.totalorder %s923_s25, %s1104_s0 }
  0x33   : > { %p704_p1 = scmp.lt.u32.totalorder %s702_s30, %s697_s27  ;;  %p706_p4 = scmp.lt.u32.totalorder %s697_s27, %s923_s25 }
  0x34   : > { %p700_p5 = pnand %p699_p3, %p698_p0 }
  0x35   : > { %p705_p2 = por %p704_p1, %p703_p10 }
  0x36   : > { %p701_p7 = pneg %p700_p5 }
  0x37   : > { %p707_p6 = por %p706_p4, %p705_p2 }
  0x39   : > { %p708_p9 = pnand %p707_p6, %p701_p7 }
  0x3b   : > { %711 = shalt.err (!%p708_p9)
}
  0x3c   : > { %s712_s5 = scalar_lea.vmem %s925_s23, 16  ;;  %s800_s6 = smov [#allocation2]  }
  0x3d   : > { %p713_p12 = scmp.ne.s32.totalorder %s925_s23, %s712_s5  ;;  %s717_s14 = sshll.u32 %s800_s6, 4  ;;  %s718_s14 = int_to_ptr.vmem [resolvable:$false] %s717_s14 }
  0x3e   : > { %s719_s18 = scalar_lea.vmem %s718_s14, 32  ;;  %p720_p5 = scmp.lt.s32.totalorder %s925_s23, %s718_s14 }
  0x3f   : > { %p715_p13 = pnand %p713_p12, %p699_p3  ;;  %p721_p10 = scmp.lt.s32.totalorder %s719_s18, %s712_s5 }
  0x41   : > { %p716_p0 = pneg %p715_p13  ;;  %p722_p1 = por %p721_p10, %p720_p5 }
  0x43   : > { %p723_p2 = pnand %p722_p1, %p716_p0 }
  0x45   : > { %726 = shalt.err (!%p723_p2)
}
  0x46   : > { %626 = dma.hbm_to_vmem [thread:$0]  (!%p927_p11), %s923_s25, 16, %s925_s23, %s122_s26  }
  0x47   : > { %p1121_p7 = scmp.ne.s32.totalorder %s1112_s17, 0 }
  0x48   : > { %s959_s21 = sand.u32 (!%p1121_p7), 1, %s789_s10   ;;  %p1122_p3 = scmp.ne.s32.totalorder (!%p1121_p7), %s1110_s15, 0 }
  0x49   : > { %140 = sbr.rel (%p1121_p7) target bundleno = 354 (0x162), region = 28  ;;  %s143_s22 = scalar_lea.sflag (!%p1121_p7), [#allocation3], %s959_s21 }
  0x4a   : > { %s145_s19 = scalar_lea.vmem (!%p1121_p7), [#allocation2], %s959_s21 }
  0x50   : > { %772 = dma.done.wait (%p1122_p3), %s143_s22, 16  }
  0x51   : > { %774 = vsyncadd (%p1122_p3), %s143_s22, 4294967280  ;;  %p1123_p4 = scmp.eq.s32.totalorder %s839_s13, 0 }
  0x53   : > { %776 = dma.done.wait (%p1123_p4), [#allocation6], 256   ;;  %p1124_p11 = pmov %p1123_p4 }
  0x54   : > { %v170_v0 = vlaneseq  ;;  %v982_v11 = vld [vmem:[%s145_s19] ss:$0 sm:$0xff]  ;;  %v304_v14 = vld [vmem:[#allocation5 + $0x8] sm:$0x3f]  ;;  %v801_v15 = vmov 1.0|1.0  }
  0x55   : > { %778 = vsyncadd (%p1124_p11), [#allocation6], 4294967040  ;;  %369 = vmatprep.mubr.f32.mxu0 %v304_v14  ;;  %v303_v36 = vld [vmem:[#allocation5] sm:$0x3f]  ;;  %s474_s15 = sshll.u32 %s959_s21, 3  ;;  %s541_s17 = sshll.u32 %s839_s13, 7 }
  0x56   : > { %v971_v1 = vshrl.u32 %v170_v0, 7  ;;  %s168_s25 = scalar_lea.vmem [#allocation7], %s474_s15  ;;  %s1060_s27 = scalar_lea.hbm %s1106_s2, %s541_s17 }
  0x57   : > { %s390_s23 = sshll.u32 %s168_s25, 4  ;;  %s377_s28 = scalar_lea.sflag [#allocation4], %s959_s21  ;;  %s1062_s23 = int_to_ptr.vmem [resolvable:$true] %s390_s23 }
  0x58   : > { %v187_v2 = vadd.s32 128, %v971_v1  ;;  %v188_v3 = vadd.s32 136, %v971_v1  ;;  %v172_v4 = vadd.s32 8, %v971_v1  ;;  %v189_v5 = vadd.s32 144, %v971_v1  ;;  %s727_s29 = scalar_lea.vmem %s1062_s23, 128  ;;  %s802_s13 = smov [#allocation7]  }
  0x59   : > { %v190_v6 = vadd.s32 152, %v971_v1  ;;  %v173_v7 = vadd.s32 16, %v971_v1  ;;  %v174_v8 = vadd.s32 24, %v971_v1  ;;  %v191_v9 = vadd.s32 160, %v971_v1  ;;  %p728_p6 = scmp.ne.s32.totalorder %s1062_s23, %s727_s29  ;;  %s731_s30 = sshll.u32 %s802_s13, 4  ;;  %s732_s30 = int_to_ptr.vmem [resolvable:$false] %s731_s30 }
  0x5a   : > { %v192_v10 = vadd.s32 168, %v971_v1  ;;  %v175_v12 = vadd.s32 32, %v971_v1  ;;  %v176_v13 = vadd.s32 40, %v971_v1  ;;  %vm223_vm0 = vcmp.eq.s32.totalorder %v187_v2, %v982_v11  ;;  %s733_s3 = scalar_lea.vmem %s732_s30, 256  ;;  %p734_p13 = scmp.lt.s32.totalorder %s1062_s23, %s732_s30 }
  0x5b   : > { %vm224_vm1 = vcmp.eq.s32.totalorder %v188_v3, %v982_v11  ;;  %vm207_vm2 = vcmp.eq.s32.totalorder %v971_v1, %v982_v11  ;;  %vm208_vm3 = vcmp.eq.s32.totalorder %v172_v4, %v982_v11  ;;  %vm225_vm5 = vcmp.eq.s32.totalorder %v189_v5, %v982_v11  ;;  %p729_p9 = pnand %p728_p6, %p910_p8  ;;  %p735_p0 = scmp.lt.s32.totalorder %s733_s3, %s727_s29 }
  0x5c   : > { %vm579_vm4 = vmpackc.low %vm224_vm1, %vm223_vm0  ;;  %vm226_vm6 = vcmp.eq.s32.totalorder %v190_v6, %v982_v11  ;;  %vm209_vm7 = vcmp.eq.s32.totalorder %v173_v7, %v982_v11  ;;  %vm210_vm8 = vcmp.eq.s32.totalorder %v174_v8, %v982_v11  ;;  %vm227_vm10 = vcmp.eq.s32.totalorder %v191_v9, %v982_v11 }
  0x5d   : > { %580 = vmatprep.subr.msk.bf16.mxu0 %vm579_vm4, %v801_v15  ;;  %vm581_vm9 = vmpackc.low %vm208_vm3, %vm207_vm2  ;;  %vm228_vm11 = vcmp.eq.s32.totalorder %v192_v10, %v982_v11  ;;  %v193_v16 = vadd.s32 176, %v971_v1  ;;  %v194_v17 = vadd.s32 184, %v971_v1  ;;  %vm211_vm15 = vcmp.eq.s32.totalorder %v175_v12, %v982_v11  ;;  %p730_p12 = pneg %p729_p9  ;;  %p736_p5 = por %p735_p0, %p734_p13 }
  0x5e   : > { %582 = vmatpush3.bf16.msk.msra.mxu0 %vm581_vm9, %v801_v15  ;;  %vm583_vm12 = vmpackc.low %vm226_vm6, %vm225_vm5  ;;  %vm212_vm0 = vcmp.eq.s32.totalorder %v176_v13, %v982_v11  ;;  %v177_v18 = vadd.s32 48, %v971_v1  ;;  %v178_v19 = vadd.s32 56, %v971_v1  ;;  %v195_v20 = vadd.s32 192, %v971_v1 }
  0x5f   : > { %584 = vmatprep.subr.msk.bf16.mxu0 %vm583_vm12, %v801_v15  ;;  %vm585_vm13 = vmpackc.low %vm210_vm8, %vm209_vm7  ;;  %vm229_vm1 = vcmp.eq.s32.totalorder %v193_v16, %v982_v11  ;;  %vm230_vm2 = vcmp.eq.s32.totalorder %v194_v17, %v982_v11  ;;  %v196_v21 = vadd.s32 200, %v971_v1  ;;  %v179_v22 = vadd.s32 64, %v971_v1  ;;  %p737_p10 = pnand %p736_p5, %p730_p12 }
  0x60   : > { %vm587_vm14 = vmpackc.low %vm228_vm11, %vm227_vm10  ;;  %vm213_vm5 = vcmp.eq.s32.totalorder %v177_v18, %v982_v11  ;;  %vm214_vm6 = vcmp.eq.s32.totalorder %v178_v19, %v982_v11  ;;  %v180_v23 = vadd.s32 72, %v971_v1  ;;  %vm231_vm7 = vcmp.eq.s32.totalorder %v195_v20, %v982_v11 }
  0x61   : > { %vm589_vm3 = vmpackc.low %vm212_vm0, %vm211_vm15  ;;  %vm232_vm8 = vcmp.eq.s32.totalorder %v196_v21, %v982_v11  ;;  %v197_v24 = vadd.s32 208, %v971_v1  ;;  %v198_v25 = vadd.s32 216, %v971_v1  ;;  %vm215_vm11 = vcmp.eq.s32.totalorder %v179_v22, %v982_v11 }
  0x62   : > { %586 = vmatpush3.bf16.msk.msra.mxu0 %vm585_vm13, %v801_v15  ;;  %vm591_vm4 = vmpackc.low %vm230_vm2, %vm229_vm1  ;;  %vm216_vm12 = vcmp.eq.s32.totalorder %v180_v23, %v982_v11  ;;  %v181_v26 = vadd.s32 80, %v971_v1  ;;  %v182_v27 = vadd.s32 88, %v971_v1  ;;  %v199_v28 = vadd.s32 224, %v971_v1 }
  0x63   : > { %588 = vmatprep.subr.msk.bf16.mxu0 %vm587_vm14, %v801_v15  ;;  %vm593_vm9 = vmpackc.low %vm214_vm6, %vm213_vm5  ;;  %vm233_vm13 = vcmp.eq.s32.totalorder %v197_v24, %v982_v11  ;;  %vm234_vm14 = vcmp.eq.s32.totalorder %v198_v25, %v982_v11  ;;  %v200_v29 = vadd.s32 232, %v971_v1  ;;  %v183_v30 = vadd.s32 96, %v971_v1 }
  0x64   : > { %vm595_vm10 = vmpackc.low %vm232_vm8, %vm231_vm7  ;;  %vm217_vm1 = vcmp.eq.s32.totalorder %v181_v26, %v982_v11  ;;  %vm218_vm2 = vcmp.eq.s32.totalorder %v182_v27, %v982_v11  ;;  %v184_v31 = vadd.s32 104, %v971_v1  ;;  %v201_v32 = vadd.s32 240, %v971_v1 }
  0x65   : > { %vm597_vm15 = vmpackc.low %vm216_vm12, %vm215_vm11  ;;  %v202_v33 = vadd.s32 248, %v971_v1  ;;  %vm219_vm7 = vcmp.eq.s32.totalorder %v183_v30, %v982_v11  ;;  %v185_v34 = vadd.s32 112, %v971_v1  ;;  %v186_v35 = vadd.s32 120, %v971_v1 }
  0x66   : > { %590 = vmatpush3.bf16.msk.msra.mxu0 %vm589_vm3, %v801_v15  ;;  %vm599_vm0 = vmpackc.low %vm234_vm14, %vm233_vm13  ;;  %vm235_vm3 = vcmp.eq.s32.totalorder %v199_v28, %v982_v11  ;;  %vm220_vm8 = vcmp.eq.s32.totalorder %v184_v31, %v982_v11 }
  0x67   : > { %592 = vmatprep.subr.msk.bf16.mxu0 %vm591_vm4, %v801_v15  ;;  %vm236_vm4 = vcmp.eq.s32.totalorder %v200_v29, %v982_v11  ;;  %vm601_vm5 = vmpackc.low %vm218_vm2, %vm217_vm1  ;;  %vm221_vm13 = vcmp.eq.s32.totalorder %v185_v34, %v982_v11  ;;  %vm222_vm14 = vcmp.eq.s32.totalorder %v186_v35, %v982_v11 }
  0x68   : > { %vm603_vm6 = vmpackc.low %vm236_vm4, %vm235_vm3 }
  0x69   : > { %vm605_vm11 = vmpackc.low %vm220_vm8, %vm219_vm7 }
  0x6a   : > { %594 = vmatpush3.bf16.msk.msra.mxu0 %vm593_vm9, %v801_v15  ;;  %vm237_vm9 = vcmp.eq.s32.totalorder %v201_v32, %v982_v11 }
  0x6b   : > { %596 = vmatprep.subr.msk.bf16.mxu0 %vm595_vm10, %v801_v15  ;;  %vm238_vm10 = vcmp.eq.s32.totalorder %v202_v33, %v982_v11 }
  0x6c   : > { %vm607_vm12 = vmpackc.low %vm238_vm10, %vm237_vm9 }
  0x6e   : > { %598 = vmatpush3.bf16.msk.msra.mxu0 %vm597_vm15, %v801_v15  ;;  %vm609_vm15 = vmpackc.low %vm222_vm14, %vm221_vm13 }
  0x6f   : > { %600 = vmatprep.subr.msk.bf16.mxu0 %vm599_vm0, %v801_v15 }
  0x72   : > { %602 = vmatpush3.bf16.msk.msra.mxu0 %vm601_vm5, %v801_v15 }
  0x73   : > { %604 = vmatprep.subr.msk.bf16.mxu0 %vm603_vm6, %v801_v15 }
  0x76   : > { %606 = vmatpush3.bf16.msk.msra.mxu0 %vm605_vm11, %v801_v15 }
  0x77   : > { %608 = vmatprep.subr.msk.bf16.mxu0 %vm607_vm12, %v801_v15 }
  0x7a   : > { %610 = vmatpush3.bf16.msk.msra.mxu0 %vm609_vm15, %v801_v15 }
  0x7d   : > { %370 = vmatmul.mubr.f32.vlgmr.msra.gmra.mrb[0].mxu0 %v303_v36 }
 0x150   : > { %v576_v37 = vpop.f32.mrb[0].mxu0 }
 0x151   : > { %v577_v38 = vpop.f32.mrb[1].mxu0 }
 0x152   : > { %v578_v39 = vadd.f32 %v577_v38, %v576_v37 }
 0x154   : > { %375 = vst [vmem:[%s168_s25] sm:$0x3f] %v578_v39 }
 0x155   : > { %740 = shalt.err (!%p737_p10)
}
 0x156   : > { %s741_s4 = scalar_lea.hbm %s1060_s27, 128  ;;  %s745_s14 = scalar_lea.hbm %s1106_s2, 256 }
 0x157   : > { %p742_p1 = scmp.ne.s32.totalorder %s1060_s27, %s741_s4  ;;  %p746_p3 = scmp.lt.u32.totalorder %s1060_s27, %s1106_s2 }
 0x158   : > { %p747_p4 = scmp.lt.u32.totalorder %s745_s14, %s741_s4  ;;  %p749_p6 = scmp.lt.u32.totalorder %s741_s4, %s1060_s27 }
 0x159   : > { %p743_p2 = pnand %p742_p1, %p910_p8 }
 0x15a   : > { %p748_p11 = por %p747_p4, %p746_p3 }
 0x15b   : > { %p744_p7 = pneg %p743_p2 }
 0x15c   : > { %p750_p9 = por %p749_p6, %p748_p11 }
 0x15e   : > { %p751_p12 = pnand %p750_p9, %p744_p7 }
 0x160   : > { %754 = shalt.err (!%p751_p12)
}
 0x161   : > { %617 = dma.vmem_to_hbm [thread:$0]  (%p910_p8), %s1062_s23, 128, %s1060_s27, %s377_s28  }
 0x162 PF: > { %s402_s22 = sand.u32 1, %s785_s9   ;;  %p1125_p13 = scmp.ne.s32.totalorder %s1111_s16, 0 }
 0x163   : > { %p1126_p0 = scmp.ge.s32.totalorder %s797_s12, 2  ;;  %s403_s19 = scalar_lea.sflag [#allocation4], %s402_s22 }
 0x165   : > { %p628_p5 = pnand %p1126_p0, %p1125_p13 }
 0x167   : > { %780 = dma.done.wait (!%p628_p5), %s403_s19, 128  }
 0x168   : > { %782 = vsyncadd (!%p628_p5), %s403_s19, 4294967168  ;;  %p16_p10 = scmp.ge.s32.totalorder %s866_s20, 4   ;;  %s1127_s9 = smov %s789_s10 }
 0x169   : > { %s1128_s10 = smov %s793_s11  ;;  %s1129_s11 = smov %s902_s7 }
 0x16a   : > { %s1130_s12 = smov %s866_s20  ;;  %18 = sbr.rel (!%p16_p10) target bundleno = 6 (0x6), region = 77 }
 0x171   :  { %408 = vsyncpa [#allocation3], 1 }
 0x172   :  { %410 = vsyncpa [#allocation3 + $0x1], 1 }
 0x173   :  { %411 = vsyncpa [#allocation6], 1 }
 0x174   :  { %412 = vsyncpa [#allocation4], 1 }
 0x175   :  { %414 = vsyncpa [#allocation4 + $0x1], 1 }

</bundles_post_ra>
